<compile_context>
chip_gen: v7x
topology: tpu7x:2x2x1
jax: 0.10.0
libtpu: 0.0.40
codegen_flags: <defaults>
</compile_context>

<pallas_src>
import functools

import jax
import jax.numpy as jnp
import numpy as np
from jax.experimental import pallas as pl
from jax.experimental.pallas import tpu as pltpu

_MAX_TILE_B = 256    # B tile cap; multiple of 32 keeps int8 tiles packing-aligned
_MAX_TILE_C = 2048   # use the full C as one lane-dense tile up to this width
_TILE_C_BIG = 1024   # C tile (multiple of 128) when C > _MAX_TILE_C


def _cdiv(a, b):
    return (a + b - 1) // b


def _loss_kernel(*refs, with_logit, has_pw, tile_b, tile_c,
                 n_rows, n_cols, need_row_mask, need_col_mask):
    if has_pw:
        preds_ref, hot_ref, pw_ref, out_ref = refs
    else:
        preds_ref, hot_ref, out_ref = refs
        pw_ref = None

    i = pl.program_id(0)
    j = pl.program_id(1)

    # Rows processed per elementwise pass: 8-row strips when the B tile is
    # 8-aligned, otherwise the whole (small) tile in one shot.
    strip_rows = 8 if tile_b % 8 == 0 else tile_b

    # Loop-invariant values hoisted out of the strip loop (JAX does not CSE
    # broadcast_in_dim, so broadcast once here).
    col_valid = None
    if need_col_mask:
        col_ids = j * tile_c + jax.lax.broadcasted_iota(
            jnp.int32, (strip_rows, tile_c), 1)
        col_valid = col_ids < n_cols
    pw = None
    if has_pw:
        pw = jnp.broadcast_to(pw_ref[...].astype(jnp.float32),
                              (strip_rows, tile_c))

    def strip_loss(x_raw, hot_raw, row0):
        """Elementwise BCE loss for one (strip_rows, tile_c) strip."""
        x = x_raw.astype(jnp.float32)          # bf16-safe upcast (v5e)
        hit = hot_raw > 0
        if with_logit:
            # softplus(x) = max(x,0) + log1p(exp(-|x|)); softplus(-x) = softplus(x) - x
            sp_pos = jnp.maximum(x, 0.0) + jnp.log1p(jnp.exp(-jnp.abs(x)))
            sp_neg = sp_pos - x
            pos = pw * sp_neg if has_pw else sp_neg
            loss = jnp.where(hit, pos, sp_pos)
        else:
            p = jnp.clip(x, 1e-10, 1.0 - 1e-10)
            loss = jnp.where(hit, -jnp.log(p), -jnp.log1p(-p))
        valid = col_valid
        if need_row_mask:
            row_ids = row0 + jax.lax.broadcasted_iota(
                jnp.int32, (strip_rows, tile_c), 0)
            rmask = row_ids < n_rows
            valid = rmask if valid is None else jnp.logical_and(valid, rmask)
        if valid is not None:
            loss = jnp.where(valid, loss, 0.0)   # exact zero for padded slots
        return loss

    if tile_b % 8 == 0:
        n_strips = tile_b // 8

        def body(s, acc):
            r0 = pl.multiple_of(s * 8, 8)
            x = preds_ref[pl.ds(r0, 8), :]
            h = hot_ref[pl.ds(r0, 8), :]
            return acc + strip_loss(x, h, i * tile_b + r0)

        acc = jax.lax.fori_loop(0, n_strips, body,
                                jnp.zeros((8, tile_c), jnp.float32),
                                unroll=2)
        out_ref[...] = acc
    else:
        # Small batch (tile_b == B < 8-aligned): single shot + sublane fold.
        loss = strip_loss(preds_ref[...], hot_ref[...], i * tile_b)
        out_ref[...] = jnp.sum(loss, axis=0, keepdims=True)


def global_classification_loss(global_preds, annotations, pos_weight=None,
                               with_logit=True):
    """JAX/Pallas equivalent of GlobalClassificationLoss.forward (mean loss)."""
    preds = jnp.asarray(global_preds)
    if preds.dtype not in (jnp.float32, jnp.bfloat16):
        preds = preds.astype(jnp.float32)
    B, C = preds.shape

    # Tile selection: full array when it fits, else 256 x 1024 blocks.
    tile_b = B if B <= _MAX_TILE_B else _MAX_TILE_B
    tile_c = C if C <= _MAX_TILE_C else _TILE_C_BIG
    nb = _cdiv(B, tile_b)
    nc = _cdiv(C, tile_c)
    need_row_mask = (nb * tile_b != B)
    need_col_mask = (nc * tile_c != C)
    out_rows = 8 if tile_b % 8 == 0 else 1

    # Multi-hot target built once with a scatter (labels < 0 or >= C dropped).
    labels = jnp.asarray(annotations)[:, :, 4].astype(jnp.int32)   # (B, A)
    hot_dtype = jnp.int8 if tile_b % 32 == 0 else jnp.int32
    rows = jax.lax.broadcasted_iota(jnp.int32, labels.shape, 0)
    cols = jnp.where(labels >= 0, labels, C)     # -1 -> out of bounds -> dropped
    one_hot = jnp.zeros((B, C), hot_dtype).at[rows, cols].set(1, mode="drop")

    in_arrays = [preds, one_hot]
    in_specs = [
        pl.BlockSpec((tile_b, tile_c), lambda i, j: (i, j)),
        pl.BlockSpec((tile_b, tile_c), lambda i, j: (i, j)),
    ]
    has_pw = pos_weight is not None
    if has_pw:
        pw = jnp.asarray(pos_weight, jnp.float32).reshape(1, C)
        in_arrays.append(pw)
        in_specs.append(pl.BlockSpec((1, tile_c), lambda i, j: (0, j)))

    kernel = functools.partial(
        _loss_kernel, with_logit=with_logit, has_pw=has_pw,
        tile_b=tile_b, tile_c=tile_c, n_rows=B, n_cols=C,
        need_row_mask=need_row_mask, need_col_mask=need_col_mask)

    partials = pl.pallas_call(
        kernel,
        out_shape=jax.ShapeDtypeStruct((nb, nc, out_rows, tile_c), jnp.float32),
        grid=(nb, nc),
        in_specs=in_specs,
        out_specs=pl.BlockSpec((None, None, out_rows, tile_c),
                               lambda i, j: (i, j, 0, 0)),
        compiler_params=pltpu.CompilerParams(
            dimension_semantics=("parallel", "parallel")),
    )(*in_arrays)

    # Tiny final reduce + reciprocal scale outside the kernel.
    return jnp.sum(partials) * (1.0 / (B * C))


def _reference_loss(global_preds, annotations, pos_weight=None, with_logit=True):
    """Pure-numpy reference mirroring the PyTorch module."""
    x = np.asarray(global_preds, np.float32)
    ann = np.asarray(annotations)
    B, C = x.shape
    one_hot = np.zeros((B, C), np.float32)
    for i in range(B):
        t = ann[i, :, 4].astype(np.int64)
        for j in range(len(t)):
            if t[j] != -1:
                one_hot[i, t[j]] = 1.0
    if with_logit:
        sp_pos = np.maximum(x, 0.0) + np.log1p(np.exp(-np.abs(x)))
        if pos_weight is None:
            pw = np.ones((1, C), np.float32)
        else:
            pw = np.asarray(pos_weight, np.float32).reshape(1, C)
        loss = pw * one_hot * (sp_pos - x) + (1.0 - one_hot) * sp_pos
    else:
        p = np.clip(x, 1e-10, 1.0 - 1e-10)
        loss = -(one_hot * np.log(p) + (1.0 - one_hot) * np.log1p(-p))
    return np.float32(loss.mean())


if __name__ == "__main__":
    B, C, A = 2, 16, 8  # batch, num_classes, num_annotations

    key = jax.random.PRNGKey(0)
    k_pred, k_box, k_lab, k_mask = jax.random.split(key, 4)

    global_preds = jax.random.normal(k_pred, (B, C), dtype=jnp.float32)

    # annotations: (B, A, 5); column 4 holds class labels, -1 marks padding.
    boxes = jax.random.uniform(k_box, (B, A, 4), dtype=jnp.float32) * 100.0
    labels = jax.random.randint(k_lab, (B, A), 0, C)
    valid = jax.random.bernoulli(k_mask, 0.6, (B, A))
    labels = jnp.where(valid, labels, -1)
    annotations = jnp.concatenate(
        [boxes, labels[..., None].astype(jnp.float32)], axis=-1)

    # 1) with_logit=True, no pos_weight.
    loss = jax.block_until_ready(
        global_classification_loss(global_preds, annotations))
    ref = _reference_loss(global_preds, annotations)
    assert np.allclose(np.asarray(loss), ref, rtol=1e-5, atol=1e-5), (loss, ref)

    # 2) with_logit=True, with pos_weight.
    pw = np.linspace(0.5, 2.0, C).astype(np.float32)
    loss_pw = jax.block_until_ready(
        global_classification_loss(global_preds, annotations, pos_weight=pw))
    ref_pw = _reference_loss(global_preds, annotations, pos_weight=pw)
    assert np.allclose(np.asarray(loss_pw), ref_pw, rtol=1e-5, atol=1e-5), (
        loss_pw, ref_pw)

    # 3) with_logit=False (inputs are probabilities).
    probs = jax.nn.sigmoid(global_preds)
    loss_p = jax.block_until_ready(
        global_classification_loss(probs, annotations, with_logit=False))
    ref_p = _reference_loss(probs, annotations, with_logit=False)
    assert np.allclose(np.asarray(loss_p), ref_p, rtol=1e-5, atol=1e-4), (
        loss_p, ref_p)

    print("KERNEL_OK")
</pallas_src>

<mosaic_0001>
module attributes {stable_mosaic.version = 11 : i64} {
  func.func @_loss_kernel(%arg0: i32, %arg1: i32, %arg2: memref<2x16xf32, #tpu.memory_space<vmem>>, %arg3: memref<2x16xi32, #tpu.memory_space<vmem>>, %arg4: memref<1x1x1x16xf32, #tpu.memory_space<vmem>>) attributes {dimension_semantics = [#tpu.dimension_semantics<parallel>, #tpu.dimension_semantics<parallel>], iteration_bounds = array<i64: 1, 1>, scalar_prefetch = 0 : i64, scratch_operands = 0 : i64, tpu.core_type = #tpu.core_type<tc>, window_params = [{transform_indices = @transform_0, window_bounds = array<i64: 2, 16>}, {transform_indices = @transform_1, window_bounds = array<i64: 2, 16>}, {transform_indices = @transform_2, window_bounds = array<i64: 1, 1, 1, 16>}]} {
    %c0 = arith.constant 0 : index
    %c0_0 = arith.constant 0 : index
    %0 = vector.load %arg2[%c0, %c0_0] : memref<2x16xf32, #tpu.memory_space<vmem>>, vector<2x16xf32>
    %c0_1 = arith.constant 0 : index
    %c0_2 = arith.constant 0 : index
    %1 = vector.load %arg3[%c0_1, %c0_2] : memref<2x16xi32, #tpu.memory_space<vmem>>, vector<2x16xi32>
    %c0_i32 = arith.constant 0 : i32
    %2 = vector.broadcast %c0_i32 : i32 to vector<2x16xi32>
    %3 = arith.cmpi sgt, %1, %2 : vector<2x16xi32>
    %cst = arith.constant 0.000000e+00 : f32
    %4 = vector.broadcast %cst : f32 to vector<2x16xf32>
    %5 = arith.maximumf %0, %4 : vector<2x16xf32>
    %6 = math.absf %0 : vector<2x16xf32>
    %cst_3 = arith.constant 0.000000e+00 : f32
    %7 = vector.broadcast %cst_3 : f32 to vector<2x16xf32>
    %8 = arith.subf %7, %6 : vector<2x16xf32>
    %9 = math.exp %8 : vector<2x16xf32>
    %10 = math.log1p %9 : vector<2x16xf32>
    %11 = arith.addf %5, %10 : vector<2x16xf32>
    %12 = arith.subf %11, %0 : vector<2x16xf32>
    %13 = arith.select %3, %12, %11 : vector<2x16xi1>, vector<2x16xf32>
    %cst_4 = arith.constant dense<0.000000e+00> : vector<16xf32>
    %14 = vector.multi_reduction <add>, %13, %cst_4 [0] : vector<2x16xf32> to vector<16xf32>
    %15 = vector.shape_cast %14 : vector<16xf32> to vector<1x16xf32>
    %c0_5 = arith.constant 0 : index
    %c0_6 = arith.constant 0 : index
    %c0_7 = arith.constant 0 : index
    %c0_8 = arith.constant 0 : index
    %16 = vector.load %arg4[%c0_5, %c0_6, %c0_7, %c0_8] : memref<1x1x1x16xf32, #tpu.memory_space<vmem>>, vector<1x1x1x16xf32>
    %17 = vector.shape_cast %16 : vector<1x1x1x16xf32> to vector<1x16xf32>
    %18 = vector.shape_cast %15 : vector<1x16xf32> to vector<1x1x1x16xf32>
    tpu.vector_store %arg4[%c0_5, %c0_6, %c0_7, %c0_8], %18 {strides = array<i32>} : memref<1x1x1x16xf32, #tpu.memory_space<vmem>>, vector<1x1x1x16xf32>,
    return
  }
  func.func @transform_0(%arg0: i32, %arg1: i32) -> (i32, i32) {
    %c0_i32 = arith.constant 0 : i32
    return %arg0, %arg1 : i32, i32
  }
  func.func @transform_1(%arg0: i32, %arg1: i32) -> (i32, i32) {
    %c0_i32 = arith.constant 0 : i32
    return %arg0, %arg1 : i32, i32
  }
  func.func @transform_2(%arg0: i32, %arg1: i32) -> (i32, i32, i32, i32) {
    %c0_i32 = arith.constant 0 : i32
    %c0_i32_0 = arith.constant 0 : i32
    %c0_i32_1 = arith.constant 0 : i32
    return %arg0, %arg1, %c0_i32, %c0_i32_0 : i32, i32, i32, i32
  }
}

</mosaic_0001>

<bundles_post_ra>
// kernel: tpu_custom_call.1
= control target key start
LH: loop header
LB: loop body
LE: loop exit
PB: predicated region body
PF: predicated region fallthrough
CT: control target
= control target key end

     0   :  { %7 = vsyncpa [#allocation3], 0  ;;  %s167_s0 = inlined_call_operand.hbm [shape: f32[2,16], index: 0, kind: input, shape index: {}]   ;;  %s168_s1 = inlined_call_operand.vmem [shape: s32[2,16], index: 1, kind: input, shape index: {}]   ;;  %s169_s2 = inlined_call_operand.hbm [shape: f32[1,1,1,16], index: 2, kind: output, shape index: {}]  }
   0x1   :  { %8 = vsyncpa [#allocation4], 0  ;;  %s123_s9 = smov [#allocation2]   ;;  %s75_s13 = scalar_lea.hbm %s167_s0, 32 }
   0x2   :  { %s15_s10 = sshll.u32 %s123_s9, 4  ;;  %p76_p0 = scmp.ne.s32.totalorder %s167_s0, %s75_s13  ;;  %s16_s10 = int_to_ptr.vmem [resolvable:$true] %s15_s10 }
   0x3   :  { %p79_p1 = scmp.lt.u32.totalorder %s75_s13, %s167_s0 }
   0x5   :  { %p81_p2 = pnand %p79_p1, %p76_p0 }
   0x7   :  { %84 = shalt.err (!%p81_p2)
}
   0x8   :  { %s85_s18 = scalar_lea.vmem %s16_s10, 32  ;;  %p90_p4 = scmp.lt.s32.totalorder %s16_s10, %s16_s10 }
   0x9   :  { %p86_p3 = scmp.ne.s32.totalorder %s16_s10, %s85_s18  ;;  %p91_p5 = scmp.lt.s32.totalorder %s85_s18, %s85_s18 }
   0xb   :  { %p92_p6 = por %p91_p5, %p90_p4 }
   0xd   :  { %p93_p7 = pnand %p92_p6, %p86_p3 }
   0xf   :  { %96 = shalt.err (!%p93_p7)
}
  0x10   :  { %18 = dma.hbm_to_vmem [thread:$0]  %s167_s0, 32, %s16_s10, [#allocation3]  }
  0x11   :  { %119 = dma.done.wait [#allocation3], 32  }
  0x12   :  { %120 = vsyncadd [#allocation3], 4294967264  ;;  %v24_v0 = vld [vmem:[#allocation2] sm:$0x3]  ;;  %vm44_vm2 = vcmask 123904   ;;  %s124_s22 = smov [#allocation5]  }
  0x13   :  { %v28_v1 = vand.u32 2147483647, %v24_v0  ;;  %v27_v11 = vmax.f32 %v24_v0, 0.0  ;;  %v25_v13 = vld [vmem:[%s168_s1] sm:$0x3]  ;;  %s60_s23 = sshll.u32 %s124_s22, 4  ;;  %s61_s23 = int_to_ptr.vmem [resolvable:$true] %s60_s23 }
  0x14   :  { %vm26_vm1 = vcmp.gt.s32.totalorder %v25_v13, 0  ;;  %vm52_vm3 = vcmask 122880   ;;  %s97_s24 = scalar_lea.vmem %s61_s23, 16  ;;  %s101_s1 = scalar_lea.vmem %s61_s23, 32 }
  0x15   :  { %v29_v2 = vsub.f32 0.0, %v28_v1  ;;  %p98_p8 = scmp.ne.s32.totalorder %s61_s23, %s97_s24  ;;  %p102_p9 = scmp.lt.s32.totalorder %s61_s23, %s61_s23 }
  0x16   :  { %p103_p10 = scmp.lt.s32.totalorder %s101_s1, %s97_s24 }
  0x17   :  { %v30_v3 = vmul.f32 1.442695, %v29_v2 }
  0x18   :  { %p104_p11 = por %p103_p10, %p102_p9 }
  0x19   :  { %71 = vpow2.f32 %v30_v3 }
  0x1a   :  { %p105_p12 = pnand %p104_p11, %p98_p8 }
  0x23   :  { %v72_v4 = vpop.eup %71 }
  0x24   :  { %v32_v5 = vadd.f32 1.0, %v72_v4  ;;  %v35_v6 = vmul.f32 -0.5, %v72_v4  ;;  %v38_v8 = vand.u32 2147483647, %v72_v4 }
  0x26   :  { %73 = vlog2.f32 %v32_v5  ;;  %v36_v7 = vadd.f32 1.0, %v35_v6  ;;  %vm39_vm0 = vcmp.lt.f32.partialorder %v38_v8, 0.0004427343 }
  0x28   :  { %v37_v9 = vmul.f32 %v72_v4, %v36_v7 }
  0x30   :  { %v74_v10 = vpop.eup %73 }
  0x31   :  { %v34_v12 = vmul.f32 0.6931472, %v74_v10 }
  0x33   :  { %v40_v14 = vsel %vm39_vm0, %v37_v9, %v34_v12 }
  0x34   :  { %v41_v15 = vadd.f32 %v40_v14, %v27_v11 }
  0x36   :  { %v42_v16 = vsub.f32 %v41_v15, %v24_v0 }
  0x38   :  { %v43_v17 = vsel %vm26_vm1, %v42_v16, %v41_v15 }
  0x39   :  { %v45_v18 = vsel %vm44_vm2, %v43_v17, 0.0 }
  0x3a   :  { %v46_v19 = vrot.slane %v45_v18, 4 }
  0x3c   :  { %v47_v20 = vadd.f32 %v46_v19, %v45_v18 }
  0x3e   :  { %v48_v21 = vrot.slane %v47_v20, 2 }
  0x40   :  { %v49_v22 = vadd.f32 %v48_v21, %v47_v20 }
  0x42   :  { %v50_v23 = vrot.slane %v49_v22, 1 }
  0x44   :  { %v51_v24 = vadd.f32 %v50_v23, %v49_v22 }
  0x46   :  { %53 = vst.msk [vmem:[#allocation5] sm:$0x1] %vm52_vm3, %v51_v24 }
  0x47   :  { %108 = shalt.err (!%p105_p12)
}
  0x48   :  { %s109_s27 = scalar_lea.hbm %s169_s2, 16 }
  0x49   :  { %p110_p13 = scmp.ne.s32.totalorder %s169_s2, %s109_s27  ;;  %p113_p0 = scmp.lt.u32.totalorder %s109_s27, %s169_s2 }
  0x4b   :  { %p115_p1 = pnand %p113_p0, %p110_p13 }
  0x4d   :  { %118 = shalt.err (!%p115_p1)
}
  0x4e   :  { %63 = dma.vmem_to_hbm [thread:$0]  %s61_s23, 16, %s169_s2, [#allocation4]  }
  0x4f   :  { %121 = dma.done.wait [#allocation4], 16  }
  0x50   :  { %122 = vsyncadd [#allocation4], 4294967280 }
  0x51   :  { %67 = vsyncpa [#allocation3], 1 }
  0x52   :  { %68 = vsyncpa [#allocation4], 1 }

</bundles_post_ra>
